<compile_context>
chip_gen: v7x
topology: tpu7x:2x2x1
jax: 0.10.0
libtpu: 0.0.40
codegen_flags: <defaults>
</compile_context>

<pallas_src>
import functools

import jax
import jax.numpy as jnp
import numpy as np
from jax.experimental import pallas as pl
from jax.experimental.pallas import tpu as pltpu

_LANE = 128
_SUBLANE = 8
_TARGET_BUFFER_BYTES = 8 << 20     # ~8 MiB per pipelined/scratch buffer
_VMEM_LIMIT = 40 << 20             # 2 out bufs + 1 in scratch <= ~24 MiB + slack


def _round_up(x, m):
    return (x + m - 1) // m * m


def _sublane_pack(dtype):
    # Packed-tile second-minor multiple: 8 for 4-byte, 16 for 2-byte, 32 for 1-byte.
    return max(_SUBLANE, 32 // jnp.dtype(dtype).itemsize)


# ----------------------------------------------------------------------------
# Main path: feat % 128 == 0.  x viewed as (N, rows, 128).  Input is a raw HBM
# ref; each kept chunk is DMA'd manually, dropped chunks write zeros only.
# ----------------------------------------------------------------------------
def _dropsample_kernel(scale_ref, x_hbm, o_ref, buf, sem, *,
                       rows, row_chunk, num_chunks):
    b = pl.program_id(0)
    r = pl.program_id(1)
    scale = scale_ref[b]                    # per-sample keep/(1-prob), f32 (SMEM)
    keep = scale > 0.0
    row0 = r * row_chunk
    tail_rows = rows - (num_chunks - 1) * row_chunk   # static Python int

    if tail_rows == row_chunk:
        # rows divides evenly into chunks: every kept chunk is a full copy.
        @pl.when(keep)
        def _():
            cp = pltpu.make_async_copy(
                x_hbm.at[pl.ds(b, 1), pl.ds(row0, row_chunk), :], buf, sem)
            cp.start()
            cp.wait()
    else:
        @pl.when(jnp.logical_and(keep, r < num_chunks - 1))
        def _():
            cp = pltpu.make_async_copy(
                x_hbm.at[pl.ds(b, 1), pl.ds(row0, row_chunk), :], buf, sem)
            cp.start()
            cp.wait()

        @pl.when(jnp.logical_and(keep, r == num_chunks - 1))
        def _():
            cp = pltpu.make_async_copy(
                x_hbm.at[pl.ds(b, 1), pl.ds(row0, tail_rows), :],
                buf.at[:, :tail_rows, :], sem)
            cp.start()
            cp.wait()

    @pl.when(keep)
    def _():
        # Multiply in f32, cast once; extra rows beyond the tail hold stale
        # data but the clipped output block never writes them back to HBM.
        o_ref[...] = (buf[...].astype(jnp.float32) * scale).astype(o_ref.dtype)

    @pl.when(jnp.logical_not(keep))
    def _():
        o_ref[...] = jnp.zeros_like(o_ref)


def _dropsample_lane_aligned(x3, scale, rows, row_chunk, num_chunks):
    n = x3.shape[0]
    kernel = functools.partial(_dropsample_kernel, rows=rows,
                               row_chunk=row_chunk, num_chunks=num_chunks)
    return pl.pallas_call(
        kernel,
        out_shape=jax.ShapeDtypeStruct((n, rows, _LANE), x3.dtype),
        grid_spec=pltpu.PrefetchScalarGridSpec(
            num_scalar_prefetch=1,                      # scale vector -> SMEM
            grid=(n, num_chunks),
            in_specs=[pl.BlockSpec(memory_space=pl.ANY)],   # raw HBM, manual DMA
            out_specs=pl.BlockSpec((1, row_chunk, _LANE),
                                   lambda b, r, scale: (b, r, 0)),
            scratch_shapes=[pltpu.VMEM((1, row_chunk, _LANE), x3.dtype),
                            pltpu.SemaphoreType.DMA(())],
        ),
        compiler_params=pltpu.CompilerParams(
            dimension_semantics=("parallel", "parallel"),
            vmem_limit_bytes=_VMEM_LIMIT,
        ),
    )(scale, x3)


# ----------------------------------------------------------------------------
# Fallback path: feat % 128 != 0.  x viewed as (N, feat); each block holds the
# whole batch so no pad/slice is ever needed (trailing block is clipped).
# ----------------------------------------------------------------------------
def _ragged_kernel(scale_ref, x_ref, o_ref):
    # scale_ref: (n, 1) f32 VMEM, x_ref/o_ref: (n, chunk)
    o_ref[...] = (x_ref[...].astype(jnp.float32) * scale_ref[...]).astype(o_ref.dtype)


def _dropsample_ragged(x_flat, scale, chunk, num_chunks):
    n, feat = x_flat.shape
    return pl.pallas_call(
        _ragged_kernel,
        out_shape=jax.ShapeDtypeStruct((n, feat), x_flat.dtype),
        grid=(num_chunks,),
        in_specs=[pl.BlockSpec((n, 1), lambda j: (0, 0)),
                  pl.BlockSpec((n, chunk), lambda j: (0, j))],
        out_specs=pl.BlockSpec((n, chunk), lambda j: (0, j)),
        compiler_params=pltpu.CompilerParams(
            dimension_semantics=("parallel",),
            vmem_limit_bytes=_VMEM_LIMIT,
        ),
    )(scale.reshape(n, 1), x_flat)


# ----------------------------------------------------------------------------
# Public wrapper (matches the PyTorch Dropsample forward semantics).
# ----------------------------------------------------------------------------
def dropsample(x, *, prob=0.0, training=True, seed=0, key=None):
    """Zero whole samples with probability `prob`, rescale survivors by 1/(1-prob)."""
    if prob == 0.0 or not training:             # PyTorch early-return path
        return x
    assert 0.0 <= prob < 1.0, "prob must be in [0, 1)"

    n, c, h, w = x.shape
    feat = c * h * w
    itemsize = jnp.dtype(x.dtype).itemsize
    pack = _sublane_pack(x.dtype)

    # Per-sample keep decision computed once outside the kernel (hoisted,
    # reproducible, independent of tiling).  Pass a fresh `key` per step when
    # training, or a distinct `seed`.
    if key is None:
        key = jax.random.PRNGKey(seed)
    u = jax.random.uniform(key, (n,), dtype=jnp.float32)
    scale = (u > prob).astype(jnp.float32) * (1.0 / (1.0 - prob))

    if feat % _LANE == 0:
        # Lane-aligned: pure (free) reshape, no pad, no slice.
        rows = feat // _LANE
        target_rows = max(pack, _TARGET_BUFFER_BYTES // (_LANE * itemsize))
        if rows <= target_rows:
            row_chunk, num_chunks = rows, 1
        else:
            num_chunks = pl.cdiv(rows, target_rows)
            row_chunk = _round_up(pl.cdiv(rows, num_chunks), pack)
            num_chunks = pl.cdiv(rows, row_chunk)
            if num_chunks == 1:
                row_chunk = rows
        x3 = x.reshape(n, rows, _LANE)
        out = _dropsample_lane_aligned(x3, scale, rows, row_chunk, num_chunks)
        return out.reshape(n, c, h, w)

    # Ragged feature size: 2-D layout, whole batch per block, clipped tail.
    # (No per-sample read skip on this path, but also no pad/slice passes.)
    x_flat = x.reshape(n, feat)
    chunk_target = max(_LANE, _TARGET_BUFFER_BYTES // max(1, n * itemsize))
    num_chunks = pl.cdiv(feat, chunk_target)
    chunk = _round_up(pl.cdiv(feat, num_chunks), _LANE)
    if chunk >= feat:
        chunk, num_chunks = feat, 1
    else:
        num_chunks = pl.cdiv(feat, chunk)
    out = _dropsample_ragged(x_flat, scale, chunk, num_chunks)
    return out.reshape(n, c, h, w)


if __name__ == "__main__":
    key = jax.random.PRNGKey(0)
    N, C, H, W = 2, 4, 16, 16
    x = jax.random.normal(key, (N, C, H, W), dtype=jnp.float32)

    # --- main (lane-aligned) path ---------------------------------------
    prob, seed = 0.25, 0
    y = jax.block_until_ready(dropsample(x, prob=prob, training=True, seed=seed))
    u = jax.random.uniform(jax.random.PRNGKey(seed), (N,), dtype=jnp.float32)
    s = (u > prob).astype(jnp.float32) / (1.0 - prob)
    y_ref = x * s[:, None, None, None]
    np.testing.assert_allclose(np.asarray(y), np.asarray(y_ref), rtol=1e-6, atol=1e-6)

    # high prob: each sample is either all-zero or exactly x / (1 - prob)
    y_hi = jax.block_until_ready(dropsample(x, prob=0.9, training=True, seed=7))
    u_hi = jax.random.uniform(jax.random.PRNGKey(7), (N,), dtype=jnp.float32)
    s_hi = (u_hi > 0.9).astype(jnp.float32) / 0.1
    np.testing.assert_allclose(np.asarray(y_hi),
                               np.asarray(x * s_hi[:, None, None, None]),
                               rtol=1e-5, atol=1e-6)
    xn, yn = np.asarray(x), np.asarray(y_hi)
    for b in range(N):
        dropped = np.allclose(yn[b], 0.0)
        kept = np.allclose(yn[b], xn[b] / 0.1, rtol=1e-5, atol=1e-5)
        assert dropped or kept, f"sample {b} neither dropped nor properly scaled"

    # --- ragged (feat % 128 != 0) path -----------------------------------
    N2, C2, H2, W2 = 3, 5, 6, 7            # feat = 210, not a multiple of 128
    x2 = jax.random.normal(jax.random.PRNGKey(1), (N2, C2, H2, W2), dtype=jnp.float32)
    y2 = jax.block_until_ready(dropsample(x2, prob=0.5, training=True, seed=3))
    u2 = jax.random.uniform(jax.random.PRNGKey(3), (N2,), dtype=jnp.float32)
    s2 = (u2 > 0.5).astype(jnp.float32) / 0.5
    np.testing.assert_allclose(np.asarray(y2),
                               np.asarray(x2 * s2[:, None, None, None]),
                               rtol=1e-6, atol=1e-6)

    # --- prob == 0 / eval mode is the identity (no kernel launch) --------
    assert np.allclose(np.asarray(dropsample(x, prob=prob, training=False)), xn)

    print("KERNEL_OK")
</pallas_src>

<mosaic_0001>
module attributes {stable_mosaic.version = 11 : i64} {
  func.func @_dropsample_kernel(%arg0: i32, %arg1: i32, %arg2: memref<2xf32, #tpu.memory_space<smem>>, %arg3: memref<2x8x128xf32, #tpu.memory_space<any>>, %arg4: memref<1x8x128xf32, #tpu.memory_space<vmem>>, %arg5: memref<1x8x128xf32, #tpu.memory_space<vmem>>, %arg6: memref<!tpu.dma_semaphore, #tpu.memory_space<semaphore_mem>>) attributes {dimension_semantics = [#tpu.dimension_semantics<parallel>, #tpu.dimension_semantics<parallel>], iteration_bounds = array<i64: 2, 1>, scalar_prefetch = 1 : i64, scratch_operands = 2 : i64, tpu.core_type = #tpu.core_type<tc>, window_params = [{}, {transform_indices = @transform_1, window_bounds = array<i64: 1, 8, 128>}]} {
    %0 = arith.index_cast %arg0 : i32 to index
    %1 = memref.load %arg2[%0] : memref<2xf32, #tpu.memory_space<smem>>
    %cst = arith.constant 0.000000e+00 : f32
    %2 = arith.cmpf ogt, %1, %cst : f32
    %c8_i32 = arith.constant 8 : i32
    %3 = arith.muli %arg1, %c8_i32 : i32
    %4 = arith.extui %2 : i1 to i32
    %c0_i32 = arith.constant 0 : i32
    %5 = arith.cmpi ne, %4, %c0_i32 : i32
    scf.if %5 {
      %c0_i32_2 = arith.constant 0 : i32
      %11 = tpu.memref_slice %arg3[%arg0, %3, %c0_i32_2] : memref<2x8x128xf32, #tpu.memory_space<any>> -> memref<1x8x128xf32, #tpu.memory_space<any>>
      tpu.enqueue_dma source(%11 : memref<1x8x128xf32, #tpu.memory_space<any>>) target(%arg5 : memref<1x8x128xf32, #tpu.memory_space<vmem>>) target_semaphore(%arg6 : memref<!tpu.dma_semaphore, #tpu.memory_space<semaphore_mem>>)
      %c0_i32_3 = arith.constant 0 : i32
      %12 = tpu.memref_slice %arg3[%arg0, %3, %c0_i32_3] : memref<2x8x128xf32, #tpu.memory_space<any>> -> memref<1x8x128xf32, #tpu.memory_space<any>>
      tpu.wait_dma2 semaphore(%arg6 : memref<!tpu.dma_semaphore, #tpu.memory_space<semaphore_mem>>) src(%12 : memref<1x8x128xf32, #tpu.memory_space<any>>) dst(%arg5 : memref<1x8x128xf32, #tpu.memory_space<vmem>>)
    } else {
    }
    %6 = arith.extui %2 : i1 to i32
    %c0_i32_0 = arith.constant 0 : i32
    %7 = arith.cmpi ne, %6, %c0_i32_0 : i32
    scf.if %7 {
      %c0 = arith.constant 0 : index
      %c0_2 = arith.constant 0 : index
      %c0_3 = arith.constant 0 : index
      %11 = vector.load %arg5[%c0, %c0_2, %c0_3] : memref<1x8x128xf32, #tpu.memory_space<vmem>>, vector<1x8x128xf32>
      %12 = vector.broadcast %1 : f32 to vector<1x8x128xf32>
      %13 = arith.mulf %11, %12 : vector<1x8x128xf32>
      %c0_4 = arith.constant 0 : index
      %c0_5 = arith.constant 0 : index
      %c0_6 = arith.constant 0 : index
      %14 = vector.load %arg4[%c0_4, %c0_5, %c0_6] : memref<1x8x128xf32, #tpu.memory_space<vmem>>, vector<1x8x128xf32>
      tpu.vector_store %arg4[%c0_4, %c0_5, %c0_6], %13 {strides = array<i32>} : memref<1x8x128xf32, #tpu.memory_space<vmem>>, vector<1x8x128xf32>,
    } else {
    }
    %true = arith.constant true
    %8 = arith.xori %2, %true : i1
    %9 = arith.extui %8 : i1 to i32
    %c0_i32_1 = arith.constant 0 : i32
    %10 = arith.cmpi ne, %9, %c0_i32_1 : i32
    scf.if %10 {
      %cst_2 = arith.constant 0.000000e+00 : f32
      %11 = vector.broadcast %cst_2 : f32 to vector<1x8x128xf32>
      %c0 = arith.constant 0 : index
      %c0_3 = arith.constant 0 : index
      %c0_4 = arith.constant 0 : index
      %12 = vector.load %arg4[%c0, %c0_3, %c0_4] : memref<1x8x128xf32, #tpu.memory_space<vmem>>, vector<1x8x128xf32>
      tpu.vector_store %arg4[%c0, %c0_3, %c0_4], %11 {strides = array<i32>} : memref<1x8x128xf32, #tpu.memory_space<vmem>>, vector<1x8x128xf32>,
    } else {
    }
    return
  }
  func.func @transform_1(%arg0: i32, %arg1: i32, %arg2: memref<2xf32, #tpu.memory_space<smem>>) -> (i32, i32, i32) {
    %c0_i32 = arith.constant 0 : i32
    %c0_i32_0 = arith.constant 0 : i32
    return %arg0, %arg1, %c0_i32 : i32, i32, i32
  }
}

</mosaic_0001>

<bundles_post_ra>
// kernel: tpu_custom_call.1
= control target key start
LH: loop header
LB: loop body
LE: loop exit
PB: predicated region body
PF: predicated region fallthrough
CT: control target
= control target key end

     0   :  { %s467_s0 = inlined_call_operand.hbm [shape: f32[2], index: 0, kind: input, shape index: {}]   ;;  %s468_s1 = inlined_call_operand.hbm [shape: f32[2,8,128], index: 1, kind: input, shape index: {}]   ;;  %s469_s2 = inlined_call_operand.hbm [shape: f32[2,8,128], index: 2, kind: output, shape index: {}]  }
   0x1   :  { %s224_s11 = scalar_lea.hbm %s467_s0, 16 }
   0x2   :  { %p225_p0 = scmp.ne.s32.totalorder %s467_s0, %s224_s11  ;;  %p228_p1 = scmp.lt.u32.totalorder %s224_s11, %s467_s0 }
   0x4   :  { %p230_p2 = pnand %p228_p1, %p225_p0 }
   0x6   :  { %233 = shalt.err (!%p230_p2)  }
   0x7   :  { %s326_s16 = smov [#allocation5]  }
   0x8   :  { %8 = dma.hbm_to_smem %s467_s0, 16, %s326_s16, [#allocation4] }
   0x9   :  { %302 = dma.done.wait [#allocation4], 16 }
   0xa   :  { %303 = vsyncadd [#allocation4], 4294967280 }
   0xb   :  { %10 = sfence }
   0xc   :  { %11 = vsyncpa [#allocation7], 0 }
   0xd   :  { %13 = vsyncpa [#allocation7 + $0x1], 0  ;;  %s357_s19 = smov 0   ;;  %s359_s20 = smov 0  }
   0xe   :  { %s361_s21 = smov 0   ;;  %s363_s22 = smov 0  }
   0xf LB: > { %s28_s0 = sadd.s32 1, %s320_s21  ;;  %s170_s23 = sadd.s32 4294967295, %s324_s22   ;;  %s324_s22 = sphi %s363_s22, %s19_s22   ;;  %s320_s21 = sphi %s361_s21, %s476_s21   ;;  %s316_s20 = sphi %s359_s20, %s475_s20   ;;  %s312_s19 = sphi %s357_s19, %s474_s19  }
  0x10   : > { %p30_p3 = scmp.ge.s32.totalorder %s28_s0, 2  ;;  %p46_p4 = scmp.ne.s32.totalorder %s316_s20, %s312_s19 }
  0x11   : > { %s37_s24 = sadd.s32 1, %s316_s20  ;;  %p47_p5 = scmp.eq.s32.totalorder %s170_s23, 1 }
  0x12   : > { %s478_s0 = smov (%p30_p3, %s28_s0), 0  ;;  %p41_p6 = scmp.eq.s32.totalorder %s324_s22, 1 }
  0x13   : > { %s32_s25 = ssub.s32 %s320_s21, %s478_s0  ;;  %p387_p9 = por %p47_p5, %p46_p4 }
  0x14   : > { %p35_p7 = scmp.eq.s32.totalorder %s32_s25, 0  ;;  %p171_p8 = scmp.ne.s32.totalorder %s32_s25, 0 }
  0x15   : > { %p172_p11 = scmp.ge.s32.totalorder %s324_s22, 2 }
  0x16   : > { %s392_s27 = scalar_select %p35_p7, %s316_s20, %s37_s24  }
  0x17   : > { %p394_p10 = por %p171_p8, %p41_p6  ;;  %56 = sbr.rel (%p172_p11) target bundleno = 91 (0x5b), region = 12 }
  0x18   : > { %s61_s29 = sand.u32 (!%p172_p11), 1, %s316_s20   ;;  %s401_s30 = sld [smem:[#allocation5 + %s320_s21]] (!%p172_p11) }
  0x19   : > { %s173_s3 = sshll.u32 (!%p172_p11), %s61_s29, 3 }
  0x1a   : > { %s406_s4 = scalar_lea.vmem (!%p172_p11), [#allocation6], %s173_s3 }
  0x1e   : > { %p470_p12 = scmp.gt.f32.partialorder %s401_s30, 0.0 }
  0x1f   : > { %s181_s5 = sshll.u32 (%p470_p12), %s320_s21, 7  ;;  %s327_s9 = smov (%p470_p12), [#allocation2]  }
  0x20   : > { %69 = sbr.rel (!%p470_p12) target bundleno = 58 (0x3a), region = 16  ;;  %s73_s8 = scalar_lea.hbm (%p470_p12), %s468_s1, %s181_s5 }
  0x21   : > { %s81_s10 = sshll.u32 (%p470_p12), %s327_s9, 4  ;;  %s234_s11 = scalar_lea.hbm (%p470_p12), %s73_s8, 128  ;;  %s82_s10 = int_to_ptr.vmem [resolvable:$true] %s81_s10 }
  0x22   : > { %p235_p13 = scmp.ne.s32.totalorder (%p470_p12), %s73_s8, %s234_s11  ;;  %s236_s14 = scalar_lea.hbm (%p470_p12), %s468_s1, 256 }
  0x23   : > { %p237_p0 = scmp.lt.u32.totalorder (%p470_p12), %s73_s8, %s468_s1  ;;  %p238_p1 = scmp.lt.u32.totalorder (%p470_p12), %s236_s14, %s234_s11 }
  0x24   : > { %p240_p3 = scmp.lt.u32.totalorder (%p470_p12), %s234_s11, %s73_s8 }
  0x25   : > { %p239_p2 = por (%p470_p12), %p238_p1, %p237_p0 }
  0x27   : > { %p241_p4 = por %p240_p3, %p239_p2 }
  0x29   : > { %p242_p5 = pnand %p241_p4, %p235_p13 }
  0x2b   : > { %245 = shalt.err (!%p242_p5)  }
  0x2c   : > { %s246_s17 = scalar_lea.vmem %s82_s10, 128  ;;  %p251_p7 = scmp.lt.s32.totalorder %s82_s10, %s82_s10 }
  0x2d   : > { %p247_p6 = scmp.ne.s32.totalorder %s82_s10, %s246_s17  ;;  %p252_p8 = scmp.lt.s32.totalorder %s246_s17, %s246_s17 }
  0x2f   : > { %p253_p11 = por %p252_p8, %p251_p7 }
  0x31   : > { %p254_p12 = pnand %p253_p11, %p247_p6 }
  0x33   : > { %257 = shalt.err (!%p254_p12)  }
  0x34   : > { %84 = dma.hbm_to_vmem [thread:$0]  %s73_s8, 128, %s82_s10, [#allocation3] }
  0x35   : > { %304 = dma.done.wait [#allocation3], 128 }
  0x36   : > { %305 = vsyncadd [#allocation3], 4294967168  ;;  %v90_v0 = vstv %s401_s30  ;;  %v89_v1 = vld [vmem:[#allocation2] sm:$0xff] }
  0x37   : > { %v91_v2 = vmul.f32 %v90_v0, %v89_v1 }
  0x39   : > { %92 = vst [vmem:[%s406_s4] sm:$0xff] %v91_v2 }
  0x3a PF: > { %p473_p13 = scmp.gt.f32.partialorder %s401_s30, 0.0 }
  0x3b   : > { %v328_v3 = vmov (!%p473_p13), 0.0  }
  0x3c   : > { %95 = sbr.rel (%p473_p13) target bundleno = 67 (0x43), region = 24  ;;  %96 = vst [vmem:[%s406_s4] sm:$0xff] (!%p473_p13), %v328_v3 }
  0x43 PF: > { %s177_s18 = sshll.u32 %s320_s21, 7  ;;  %s112_s3 = sshll.u32 %s406_s4, 4  ;;  %s113_s3 = int_to_ptr.vmem [resolvable:$true] %s112_s3 }
  0x44   : > { %s429_s25 = scalar_lea.hbm %s469_s2, %s177_s18  ;;  %s98_s5 = scalar_lea.sflag [#allocation7], %s61_s29 }
  0x45   : > { %s258_s30 = scalar_lea.vmem %s113_s3, 128  ;;  %s329_s6 = smov [#allocation6]  }
  0x46   : > { %p259_p12 = scmp.ne.s32.totalorder %s113_s3, %s258_s30  ;;  %s262_s7 = sshll.u32 %s329_s6, 4  ;;  %s263_s7 = int_to_ptr.vmem [resolvable:$false] %s262_s7 }
  0x47   : > { %s264_s8 = scalar_lea.vmem %s263_s7, 256  ;;  %p265_p2 = scmp.lt.s32.totalorder %s113_s3, %s263_s7 }
  0x48   : > { %p260_p0 = pnand %p259_p12, %p394_p10  ;;  %p266_p3 = scmp.lt.s32.totalorder %s264_s8, %s258_s30 }
  0x4a   : > { %p261_p1 = pneg %p260_p0  ;;  %p267_p4 = por %p266_p3, %p265_p2 }
  0x4c   : > { %p268_p5 = pnand %p267_p4, %p261_p1 }
  0x4e   : > { %271 = shalt.err (!%p268_p5)
}
  0x4f   : > { %s272_s21 = scalar_lea.hbm %s429_s25, 128  ;;  %s276_s9 = scalar_lea.hbm %s469_s2, 256 }
  0x50   : > { %p273_p6 = scmp.ne.s32.totalorder %s429_s25, %s272_s21  ;;  %p277_p11 = scmp.lt.u32.totalorder %s429_s25, %s469_s2 }
  0x51   : > { %p278_p13 = scmp.lt.u32.totalorder %s276_s9, %s272_s21  ;;  %p280_p0 = scmp.lt.u32.totalorder %s272_s21, %s429_s25 }
  0x52   : > { %p274_p7 = pnand %p273_p6, %p394_p10 }
  0x53   : > { %p279_p12 = por %p278_p13, %p277_p11 }
  0x54   : > { %p275_p8 = pneg %p274_p7 }
  0x55   : > { %p281_p1 = por %p280_p0, %p279_p12 }
  0x57   : > { %p282_p2 = pnand %p281_p1, %p275_p8 }
  0x59   : > { %285 = shalt.err (!%p282_p2)
}
  0x5a   : > { %182 = dma.vmem_to_hbm [thread:$0]  (%p394_p10), %s113_s3, 128, %s429_s25, %s98_s5  }
  0x5b PF: > { %p188_p3 = scmp.ge.s32.totalorder %s324_s22, 1  ;;  %s124_s12 = sand.u32 1, %s312_s19  }
  0x5c   : > { %s125_s13 = scalar_lea.sflag [#allocation7], %s124_s12 }
  0x5d   : > { %p185_p4 = pnand %p188_p3, %p387_p9 }
  0x5f   : > { %307 = dma.done.wait (!%p185_p4), %s125_s13, 128  }
  0x60   : > { %309 = vsyncadd (!%p185_p4), %s125_s13, 4294967168  ;;  %s19_s22 = sadd.s32 1, %s324_s22   ;;  %s474_s19 = smov %s316_s20 }
  0x61   : > { %p16_p5 = scmp.ge.s32.totalorder %s19_s22, 3   ;;  %s475_s20 = smov %s392_s27 }
  0x62   : > { %s476_s21 = smov %s478_s0 }
  0x63   :  { %18 = sbr.rel (!%p16_p5) target bundleno = 15 (0xf), region = 57 }
  0x6a   :  { %130 = vsyncpa [#allocation7], 1 }
  0x6b   :  { %132 = vsyncpa [#allocation7 + $0x1], 1 }
  0x6c   :  { %133 = vsyncmov [#allocation3] }
  0x6f   :  { %s134_s26 = vpop.sfrf %133 }
  0x70   :  { %p180_p9 = scmp.ne.s32.totalorder %s134_s26, 0 }
  0x72   :  { %138 = shalt.err (%p180_p9)  }

</bundles_post_ra>
